<compile_context>
chip_gen: v5e
topology: v5e:2x2
jax: 0.10.0
libtpu: 0.0.40
codegen_flags: <defaults>
</compile_context>

<pallas_src>
import jax
import jax.numpy as jnp
from jax.experimental import pallas as pl
from jax.experimental.pallas import tpu as pltpu


def _cdiv(a, b):
    return (a + b - 1) // b


def _round_up(x, m):
    return ((x + m - 1) // m) * m


def _pad_dim(n):
    """Pad a feature dim to a lane multiple; prefer 256 (v6e/v7x MXU width)
    when that adds <15% padding over the 128-multiple."""
    p128 = _round_up(n, 128)
    p256 = _round_up(n, 256)
    return p256 if p256 <= int(1.15 * p128) else p128


def _choose_batch_tile(B, block_m):
    """Balanced batch tiles (waste capped at one 16-row remainder); keep >=2
    (ideally >=4) tiles when B is large enough so megacore (v7x) has work."""
    min_tiles = 1
    if B >= 1024:
        min_tiles = 4
    elif B >= 512:
        min_tiles = 2
    n_tiles = max(_cdiv(B, block_m), min_tiles)
    return _round_up(_cdiv(B, n_tiles), 16)


def _mlp_2hl_g_kernel(x_ref, w1_ref, b1_ref, w2_ref, b2_ref, w3_ref, b3_ref, o_ref):
    """Fused 3-layer MLP on one (TM, k1_p) batch tile of the concatenated input.

    Weights are bf16 (MXU inputs); bias-add / activations in f32; output cast
    to o_ref.dtype (bf16 by default) on the final store.
    """
    # fc1 + LeakyReLU(0.2)
    h = jnp.dot(x_ref[...], w1_ref[...],
                preferred_element_type=jnp.float32) + b1_ref[...]
    h = jnp.maximum(h, 0.2 * h)

    # fc2 + LeakyReLU(0.2)
    h = jnp.dot(h.astype(jnp.bfloat16), w2_ref[...],
                preferred_element_type=jnp.float32) + b2_ref[...]
    h = jnp.maximum(h, 0.2 * h)

    # fc3 + ReLU
    h = jnp.dot(h.astype(jnp.bfloat16), w3_ref[...],
                preferred_element_type=jnp.float32) + b3_ref[...]
    o_ref[...] = jnp.maximum(h, 0.0).astype(o_ref.dtype)


def mlp_2hl_g_forward(noise, att, packed_params, res_size, *,
                      block_m=1024, out_dtype=jnp.bfloat16):
    """Forward pass. `packed_params` from pack_params().

    Returns (B, res_size) in `out_dtype` (bf16 by default — keep f32 only if
    the consumer really needs it; the in-kernel math is f32 either way).
    Note: on v5e a smaller block_m (256-512) may be preferable (single vst slot).
    """
    w1p, b1p, w2p, b2p, w3p, b3p = packed_params
    B = noise.shape[0]
    k1_p = w1p.shape[0]       # padded (nz + att) dim
    ngh_p = w2p.shape[0]
    res_p = w3p.shape[1]

    # Concat once in the wrapper (matches torch.cat((noise, att), 1)), pad the
    # K dim to the lane multiple (zero rows of w1p make this exact), cast bf16.
    x = jnp.concatenate([noise, att], axis=1)
    k1 = x.shape[1]
    if k1_p != k1:
        x = jnp.pad(x, ((0, 0), (0, k1_p - k1)))

    # Balanced batch tiling.
    tm = _choose_batch_tile(B, block_m)
    b_pad = _round_up(B, tm)
    if b_pad != B:
        x = jnp.pad(x, ((0, b_pad - B), (0, 0)))
    x = x.astype(jnp.bfloat16)

    grid = (b_pad // tm,)
    out_bytes = jnp.dtype(out_dtype).itemsize

    def row_spec(shape):          # tiled along batch
        return pl.BlockSpec(shape, lambda i: (i, 0))

    def resident_spec(shape):     # weights/biases stay in VMEM across iterations
        return pl.BlockSpec(shape, lambda i: (0, 0))

    # VMEM budget from the actual working set (+50% slack), clamped to ~85% of
    # physical VMEM when queryable (v7x only has 64 MiB total per TC).
    resident_bytes = 2 * (w1p.size + w2p.size + w3p.size) \
        + 4 * (b1p.size + b2p.size + b3p.size)
    io_bytes_vmem = 2 * (tm * k1_p * 2 + tm * res_p * out_bytes)   # double-buffered
    interm_bytes = 2 * tm * ngh_p * 4                              # f32 hidden acts
    vmem_limit = max(int(1.5 * (resident_bytes + io_bytes_vmem + interm_bytes)),
                     32 * 1024 * 1024)
    try:
        cap = pltpu.get_tpu_info().vmem_capacity_bytes
        vmem_limit = min(vmem_limit, int(0.85 * cap))
    except Exception:
        vmem_limit = min(vmem_limit, 100 * 1024 * 1024)

    flops = 2 * b_pad * (k1_p * ngh_p + ngh_p * ngh_p + ngh_p * res_p)
    bytes_accessed = (
        2 * (x.size + w1p.size + w2p.size + w3p.size)      # bf16 inputs/weights
        + 4 * (b1p.size + b2p.size + b3p.size)             # f32 biases
        + out_bytes * b_pad * res_p                         # output stream
    )

    out = pl.pallas_call(
        _mlp_2hl_g_kernel,
        out_shape=jax.ShapeDtypeStruct((b_pad, res_p), out_dtype),
        grid=grid,
        in_specs=[
            row_spec((tm, k1_p)),
            resident_spec(w1p.shape), resident_spec(b1p.shape),
            resident_spec(w2p.shape), resident_spec(b2p.shape),
            resident_spec(w3p.shape), resident_spec(b3p.shape),
        ],
        out_specs=row_spec((tm, res_p)),
        compiler_params=pltpu.CompilerParams(
            dimension_semantics=("parallel",),
            vmem_limit_bytes=vmem_limit,
        ),
        cost_estimate=pl.CostEstimate(
            flops=flops, transcendentals=0, bytes_accessed=bytes_accessed),
    )(x, w1p, b1p, w2p, b2p, w3p, b3p)

    # Slice the logical (unpadded) result only if padding was introduced.
    # (Downstream consumers that can work on the padded layout should, to
    # avoid this extra read+write pass over the output.)
    if (b_pad, res_p) != (B, res_size):
        out = out[:B, :res_size]
    return out


def init_params(key, att_size, nz, ngh, res_size):
    """Logical f32 params mirroring weights_init: W ~ N(0, 0.02), b = 0.

    Weights are stored transposed vs. nn.Linear, i.e. shape (in, out), so the
    kernel computes x @ W + b. The first `nz` rows of w1 multiply `noise`, the
    remaining `att_size` rows multiply `att` (matching torch.cat((noise, att), 1)).
    """
    k1, k2, k3 = jax.random.split(key, 3)
    in1 = att_size + nz
    w1 = 0.02 * jax.random.normal(k1, (in1, ngh), dtype=jnp.float32)
    b1 = jnp.zeros((ngh,), dtype=jnp.float32)
    w2 = 0.02 * jax.random.normal(k2, (ngh, ngh), dtype=jnp.float32)
    b2 = jnp.zeros((ngh,), dtype=jnp.float32)
    w3 = 0.02 * jax.random.normal(k3, (ngh, res_size), dtype=jnp.float32)
    b3 = jnp.zeros((res_size,), dtype=jnp.float32)
    return (w1, b1, w2, b2, w3, b3)


def pack_params(params):
    """Pad feature dims to lane multiples (128, or 256 when cheap) and cast
    weights to bf16 (MXU inputs). Biases stay f32, shaped (1, out).
    Zero-padding keeps the math exact."""
    w1, b1, w2, b2, w3, b3 = params
    in1 = w1.shape[0]
    ngh = w2.shape[0]
    res = w3.shape[1]
    in1_p = _pad_dim(in1)
    ngh_p = _pad_dim(ngh)
    res_p = _pad_dim(res)

    w1p = jnp.pad(w1, ((0, in1_p - in1), (0, ngh_p - ngh))).astype(jnp.bfloat16)
    b1p = jnp.pad(b1, (0, ngh_p - ngh)).reshape(1, ngh_p)

    w2p = jnp.pad(w2, ((0, ngh_p - ngh), (0, ngh_p - ngh))).astype(jnp.bfloat16)
    b2p = jnp.pad(b2, (0, ngh_p - ngh)).reshape(1, ngh_p)

    w3p = jnp.pad(w3, ((0, ngh_p - ngh), (0, res_p - res))).astype(jnp.bfloat16)
    b3p = jnp.pad(b3, (0, res_p - res)).reshape(1, res_p)

    return (w1p, b1p, w2p, b2p, w3p, b3p)


if __name__ == "__main__":
    # Small shapes consistent with the module: opt.attSize=16, opt.nz=16,
    # opt.ngh=32, opt.resSize=64, batch=2.
    BATCH, ATT_SIZE, NZ, NGH, RES_SIZE = 2, 16, 16, 32, 64

    key = jax.random.PRNGKey(0)
    k_noise, k_att, k_params = jax.random.split(key, 3)

    noise = jax.random.normal(k_noise, (BATCH, NZ), dtype=jnp.float32)
    att = jax.random.normal(k_att, (BATCH, ATT_SIZE), dtype=jnp.float32)

    params_f32 = init_params(k_params, ATT_SIZE, NZ, NGH, RES_SIZE)
    packed = pack_params(params_f32)

    out = mlp_2hl_g_forward(noise, att, packed, RES_SIZE)
    jax.block_until_ready(out)

    # Pure-JAX f32 reference of the same forward pass (unpadded weights).
    w1, b1, w2, b2, w3, b3 = params_f32
    x = jnp.concatenate([noise, att], axis=1)
    h = x @ w1 + b1
    h = jnp.where(h > 0, h, 0.2 * h)
    h = h @ w2 + b2
    h = jnp.where(h > 0, h, 0.2 * h)
    ref = jnp.maximum(h @ w3 + b3, 0.0)

    assert out.shape == (BATCH, RES_SIZE)
    # Loose tolerance: MXU inputs and the stored output are bf16 (expected rounding).
    err = jnp.max(jnp.abs(out.astype(jnp.float32) - ref))
    assert jnp.allclose(out.astype(jnp.float32), ref, atol=5e-3, rtol=5e-2), (
        f"max abs err = {float(err)}")

    print("KERNEL_OK")
</pallas_src>

<mosaic_0001>
module attributes {stable_mosaic.version = 11 : i64} {
  func.func @_mlp_2hl_g_kernel(%arg0: i32, %arg1: memref<16x128xbf16, #tpu.memory_space<vmem>>, %arg2: memref<128x128xbf16, #tpu.memory_space<vmem>>, %arg3: memref<1x128xf32, #tpu.memory_space<vmem>>, %arg4: memref<128x128xbf16, #tpu.memory_space<vmem>>, %arg5: memref<1x128xf32, #tpu.memory_space<vmem>>, %arg6: memref<128x128xbf16, #tpu.memory_space<vmem>>, %arg7: memref<1x128xf32, #tpu.memory_space<vmem>>, %arg8: memref<16x128xbf16, #tpu.memory_space<vmem>>) attributes {dimension_semantics = [#tpu.dimension_semantics<parallel>], iteration_bounds = array<i64: 1>, scalar_prefetch = 0 : i64, scratch_operands = 0 : i64, tpu.core_type = #tpu.core_type<tc>, window_params = [{transform_indices = @transform_0, window_bounds = array<i64: 16, 128>}, {pipeline_mode = #tpu.pipeline_mode<synchronous>, transform_indices = @transform_1, window_bounds = array<i64: 128, 128>}, {pipeline_mode = #tpu.pipeline_mode<synchronous>, transform_indices = @transform_2, window_bounds = array<i64: 1, 128>}, {pipeline_mode = #tpu.pipeline_mode<synchronous>, transform_indices = @transform_3, window_bounds = array<i64: 128, 128>}, {pipeline_mode = #tpu.pipeline_mode<synchronous>, transform_indices = @transform_4, window_bounds = array<i64: 1, 128>}, {pipeline_mode = #tpu.pipeline_mode<synchronous>, transform_indices = @transform_5, window_bounds = array<i64: 128, 128>}, {pipeline_mode = #tpu.pipeline_mode<synchronous>, transform_indices = @transform_6, window_bounds = array<i64: 1, 128>}, {transform_indices = @transform_7, window_bounds = array<i64: 16, 128>}]} {
    %c0 = arith.constant 0 : index
    %c0_0 = arith.constant 0 : index
    %0 = vector.load %arg1[%c0, %c0_0] : memref<16x128xbf16, #tpu.memory_space<vmem>>, vector<16x128xbf16>
    %c0_1 = arith.constant 0 : index
    %c0_2 = arith.constant 0 : index
    %1 = vector.load %arg2[%c0_1, %c0_2] : memref<128x128xbf16, #tpu.memory_space<vmem>>, vector<128x128xbf16>
    %cst = arith.constant dense<0.000000e+00> : vector<16x128xf32>
    %2 = tpu.matmul %0, %1, %cst {dimension_numbers = #tpu.dot_dimension_numbers<[1], [0], [0], [1], [0, 0, 1, 1], [], []>} : vector<16x128xbf16>, vector<128x128xbf16>, vector<16x128xf32> -> vector<16x128xf32>
    %c0_3 = arith.constant 0 : index
    %c0_4 = arith.constant 0 : index
    %3 = vector.load %arg3[%c0_3, %c0_4] : memref<1x128xf32, #tpu.memory_space<vmem>>, vector<1x128xf32>
    %4 = vector.broadcast %3 : vector<1x128xf32> to vector<16x128xf32>
    %5 = arith.addf %2, %4 : vector<16x128xf32>
    %cst_5 = arith.constant 2.000000e-01 : f32
    %6 = vector.broadcast %cst_5 : f32 to vector<16x128xf32>
    %7 = arith.mulf %6, %5 : vector<16x128xf32>
    %8 = arith.maximumf %5, %7 : vector<16x128xf32>
    %9 = arith.truncf %8 : vector<16x128xf32> to vector<16x128xbf16>
    %c0_6 = arith.constant 0 : index
    %c0_7 = arith.constant 0 : index
    %10 = vector.load %arg4[%c0_6, %c0_7] : memref<128x128xbf16, #tpu.memory_space<vmem>>, vector<128x128xbf16>
    %cst_8 = arith.constant dense<0.000000e+00> : vector<16x128xf32>
    %11 = tpu.matmul %9, %10, %cst_8 {dimension_numbers = #tpu.dot_dimension_numbers<[1], [0], [0], [1], [0, 0, 1, 1], [], []>} : vector<16x128xbf16>, vector<128x128xbf16>, vector<16x128xf32> -> vector<16x128xf32>
    %c0_9 = arith.constant 0 : index
    %c0_10 = arith.constant 0 : index
    %12 = vector.load %arg5[%c0_9, %c0_10] : memref<1x128xf32, #tpu.memory_space<vmem>>, vector<1x128xf32>
    %13 = vector.broadcast %12 : vector<1x128xf32> to vector<16x128xf32>
    %14 = arith.addf %11, %13 : vector<16x128xf32>
    %cst_11 = arith.constant 2.000000e-01 : f32
    %15 = vector.broadcast %cst_11 : f32 to vector<16x128xf32>
    %16 = arith.mulf %15, %14 : vector<16x128xf32>
    %17 = arith.maximumf %14, %16 : vector<16x128xf32>
    %18 = arith.truncf %17 : vector<16x128xf32> to vector<16x128xbf16>
    %c0_12 = arith.constant 0 : index
    %c0_13 = arith.constant 0 : index
    %19 = vector.load %arg6[%c0_12, %c0_13] : memref<128x128xbf16, #tpu.memory_space<vmem>>, vector<128x128xbf16>
    %cst_14 = arith.constant dense<0.000000e+00> : vector<16x128xf32>
    %20 = tpu.matmul %18, %19, %cst_14 {dimension_numbers = #tpu.dot_dimension_numbers<[1], [0], [0], [1], [0, 0, 1, 1], [], []>} : vector<16x128xbf16>, vector<128x128xbf16>, vector<16x128xf32> -> vector<16x128xf32>
    %c0_15 = arith.constant 0 : index
    %c0_16 = arith.constant 0 : index
    %21 = vector.load %arg7[%c0_15, %c0_16] : memref<1x128xf32, #tpu.memory_space<vmem>>, vector<1x128xf32>
    %22 = vector.broadcast %21 : vector<1x128xf32> to vector<16x128xf32>
    %23 = arith.addf %20, %22 : vector<16x128xf32>
    %cst_17 = arith.constant 0.000000e+00 : f32
    %24 = vector.broadcast %cst_17 : f32 to vector<16x128xf32>
    %25 = arith.maximumf %23, %24 : vector<16x128xf32>
    %26 = arith.truncf %25 : vector<16x128xf32> to vector<16x128xbf16>
    %c0_18 = arith.constant 0 : index
    %c0_19 = arith.constant 0 : index
    %27 = vector.load %arg8[%c0_18, %c0_19] : memref<16x128xbf16, #tpu.memory_space<vmem>>, vector<16x128xbf16>
    tpu.vector_store %arg8[%c0_18, %c0_19], %26 {strides = array<i32>} : memref<16x128xbf16, #tpu.memory_space<vmem>>, vector<16x128xbf16>,
    return
  }
  func.func @transform_0(%arg0: i32) -> (i32, i32) {
    %c0_i32 = arith.constant 0 : i32
    %c0_i32_0 = arith.constant 0 : i32
    return %arg0, %c0_i32 : i32, i32
  }
  func.func @transform_1(%arg0: i32) -> (i32, i32) {
    %c0_i32 = arith.constant 0 : i32
    %c0_i32_0 = arith.constant 0 : i32
    %c0_i32_1 = arith.constant 0 : i32
    return %c0_i32, %c0_i32_0 : i32, i32
  }
  func.func @transform_2(%arg0: i32) -> (i32, i32) {
    %c0_i32 = arith.constant 0 : i32
    %c0_i32_0 = arith.constant 0 : i32
    %c0_i32_1 = arith.constant 0 : i32
    return %c0_i32, %c0_i32_0 : i32, i32
  }
  func.func @transform_3(%arg0: i32) -> (i32, i32) {
    %c0_i32 = arith.constant 0 : i32
    %c0_i32_0 = arith.constant 0 : i32
    %c0_i32_1 = arith.constant 0 : i32
    return %c0_i32, %c0_i32_0 : i32, i32
  }
  func.func @transform_4(%arg0: i32) -> (i32, i32) {
    %c0_i32 = arith.constant 0 : i32
    %c0_i32_0 = arith.constant 0 : i32
    %c0_i32_1 = arith.constant 0 : i32
    return %c0_i32, %c0_i32_0 : i32, i32
  }
  func.func @transform_5(%arg0: i32) -> (i32, i32) {
    %c0_i32 = arith.constant 0 : i32
    %c0_i32_0 = arith.constant 0 : i32
    %c0_i32_1 = arith.constant 0 : i32
    return %c0_i32, %c0_i32_0 : i32, i32
  }
  func.func @transform_6(%arg0: i32) -> (i32, i32) {
    %c0_i32 = arith.constant 0 : i32
    %c0_i32_0 = arith.constant 0 : i32
    %c0_i32_1 = arith.constant 0 : i32
    return %c0_i32, %c0_i32_0 : i32, i32
  }
  func.func @transform_7(%arg0: i32) -> (i32, i32) {
    %c0_i32 = arith.constant 0 : i32
    %c0_i32_0 = arith.constant 0 : i32
    return %arg0, %c0_i32 : i32, i32
  }
}

</mosaic_0001>

<bundles_post_ra>
// kernel: tpu_custom_call.1
= control target key start
LH: loop header
LB: loop body
LE: loop exit
PB: predicated region body
PF: predicated region fallthrough
CT: control target
= control target key end

     0   :  { %12 = vsyncpa [#allocation3], 0  ;;  %s735_s0 = inlined_call_operand.hbm [shape: bf16[16,128], index: 0, kind: input, shape index: {}]   ;;  %s736_s1 = inlined_call_operand.hbm [shape: bf16[128,128], index: 1, kind: input, shape index: {}]   ;;  %s737_s2 = inlined_call_operand.vmem [shape: f32[1,128], index: 2, kind: input, shape index: {}]   ;;  %s738_s3 = inlined_call_operand.hbm [shape: bf16[128,128], index: 3, kind: input, shape index: {}]   ;;  %s739_s4 = inlined_call_operand.vmem [shape: f32[1,128], index: 4, kind: input, shape index: {}]   ;;  %s740_s5 = inlined_call_operand.hbm [shape: bf16[128,128], index: 5, kind: input, shape index: {}]   ;;  %s741_s6 = inlined_call_operand.vmem [shape: f32[1,128], index: 6, kind: input, shape index: {}]   ;;  %s742_s7 = inlined_call_operand.hbm [shape: bf16[16,128], index: 7, kind: output, shape index: {}]  }
   0x1   :  { %13 = vsyncpa [#allocation6], 0 }
   0x2   :  { %14 = vsyncpa [#allocation9], 0 }
   0x3   :  { %15 = vsyncpa [#allocation4], 0  ;;  %s33_s26 = sshll.u32 %s736_s1, 4  ;;  %s649_s27 = smov [#allocation5]   ;;  %s34_s26 = int_to_ptr.hbm [resolvable:$true] %s33_s26 }
   0x4   :  { %s35_s28 = sshll.u32 %s649_s27, 4  ;;  %s20_s8 = sshll.u32 %s735_s0, 4  ;;  %s36_s28 = int_to_ptr.vmem [resolvable:$true] %s35_s28  ;;  %s21_s8 = int_to_ptr.hbm [resolvable:$true] %s20_s8 }
   0x5   :  { %s650_s9 = smov 64   ;;  %s651_s10 = smov 4  }
   0x6   :  { %41 = dma.hbm_to_vmem [thread:$0]  %s34_s26, 1024, %s36_s28, [#allocation6], %s650_s9, %s650_s9, %s651_s10  }
   0x7   :  { %s652_s11 = smov [#allocation2]   ;;  %s48_s1 = sshll.u32 %s738_s3, 4  ;;  %s49_s1 = int_to_ptr.hbm [resolvable:$true] %s48_s1 }
   0x8   :  { %s22_s12 = sshll.u32 %s652_s11, 4  ;;  %s63_s16 = sshll.u32 %s740_s5, 4  ;;  %s23_s12 = int_to_ptr.vmem [resolvable:$true] %s22_s12  ;;  %s64_s16 = int_to_ptr.hbm [resolvable:$true] %s63_s16 }
   0x9   :  { %28 = dma.hbm_to_vmem [thread:$0]  %s21_s8, 128, %s23_s12, [#allocation3], %s650_s9, %s650_s9, %s651_s10  }
   0xa   :  { %s653_s17 = smov [#allocation7]   ;;  %s654_s19 = smov [#allocation8]  }
   0xb   :  { %s50_s18 = sshll.u32 %s653_s17, 4  ;;  %s65_s3 = sshll.u32 %s654_s19, 4  ;;  %s51_s18 = int_to_ptr.vmem [resolvable:$true] %s50_s18  ;;  %s66_s3 = int_to_ptr.vmem [resolvable:$true] %s65_s3 }
   0xc   :  { %56 = dma.hbm_to_vmem [thread:$0]  %s49_s1, 1024, %s51_s18, [#allocation6], %s650_s9, %s650_s9, %s651_s10  }
   0xd   :  { %71 = dma.hbm_to_vmem [thread:$0]  %s64_s16, 1024, %s66_s3, [#allocation9], %s650_s9, %s650_s9, %s651_s10  }
   0xe   :  { %641 = dma.done.wait [#allocation3], 128  }
   0xf   :  { %642 = vsyncadd [#allocation3], 4294967168 }
  0x10   :  { %643 = dma.done.wait [#allocation6], 2048  }
  0x11   :  { %644 = vsyncadd [#allocation6], 4294965248 }
  0x12   :  { %645 = dma.done.wait [#allocation9], 1024  }
  0x13   :  { %646 = vsyncadd [#allocation9], 4294966272  ;;  %v489_v0 = vld [vmem:[#allocation5 + $0x38] sm:$0xff]  ;;  %v488_v1 = vld [vmem:[#allocation5 + $0x30] sm:$0xff]  ;;  %s655_s24 = smov [#allocation10]   ;;  %s366_s27 = sshll.u32 %s742_s7, 4  ;;  %s367_s27 = int_to_ptr.hbm [resolvable:$true] %s366_s27 }
  0x14   :  { %166 = vmatpush.bf16.msra.mxu0 %v489_v0  ;;  %v497_v2 = vld [vmem:[#allocation7 + $0x38] sm:$0xff]  ;;  %v496_v3 = vld [vmem:[#allocation7 + $0x30] sm:$0xff]  ;;  %v487_v4 = vld [vmem:[#allocation5 + $0x28] sm:$0xff]  ;;  %s364_s25 = sshll.u32 %s655_s24, 4  ;;  %s365_s25 = int_to_ptr.vmem [resolvable:$true] %s364_s25 }
  0x15   :  { %253 = vmatpush.bf16.msra.mxu1 %v497_v2  ;;  %v495_v5 = vld [vmem:[#allocation7 + $0x28] sm:$0xff]  ;;  %v486_v6 = vld [vmem:[#allocation5 + $0x20] sm:$0xff]  ;;  %v485_v8 = vld [vmem:[#allocation5 + $0x18] sm:$0xff] }
  0x16   :  { %v494_v7 = vld [vmem:[#allocation7 + $0x20] sm:$0xff]  ;;  %v484_v9 = vld [vmem:[#allocation5 + $0x10] sm:$0xff]  ;;  %v483_v10 = vld [vmem:[#allocation5 + $0x8] sm:$0xff] }
  0x17   :  { %v482_v11 = vld [vmem:[#allocation5] sm:$0xff]  ;;  %v481_v12 = vld [vmem:[#allocation2] sm:$0xff]  ;;  %v492_v14 = vld [vmem:[#allocation7 + $0x10] sm:$0xff] }
  0x18   :  { %167 = vmatpush.bf16.msra.mxu0 %v488_v1  ;;  %v493_v13 = vld [vmem:[#allocation7 + $0x18] sm:$0xff]  ;;  %v491_v15 = vld [vmem:[#allocation7 + $0x8] sm:$0xff]  ;;  %v490_v16 = vld [vmem:[#allocation7] sm:$0xff] }
  0x19   :  { %254 = vmatpush.bf16.msra.mxu1 %v496_v3  ;;  %v505_v17 = vld [vmem:[#allocation8 + $0x38] sm:$0xff]  ;;  %v504_v18 = vld [vmem:[#allocation8 + $0x30] sm:$0xff]  ;;  %v503_v19 = vld [vmem:[#allocation8 + $0x28] sm:$0xff] }
  0x1a   :  { %340 = vmatpush.bf16.msra.mxu2 %v505_v17  ;;  %v502_v20 = vld [vmem:[#allocation8 + $0x20] sm:$0xff]  ;;  %v518_v22 = vld [vmem:[%s737_s2] ss:$0 sm:$0xff]  ;;  %v500_v32 = vld [vmem:[#allocation8 + $0x10] sm:$0xff] }
  0x1b   :  { %v501_v31 = vld [vmem:[#allocation8 + $0x18] sm:$0xff]  ;;  %v499_v33 = vld [vmem:[#allocation8 + $0x8] sm:$0xff]  ;;  %v498_v34 = vld [vmem:[#allocation8] sm:$0xff] }
  0x1c   :  { %168 = vmatpush.bf16.msra.mxu0 %v487_v4  ;;  %v519_v36 = vld [vmem:[%s739_s4] ss:$0 sm:$0xff] }
  0x1d   :  { %255 = vmatpush.bf16.msra.mxu1 %v495_v5  ;;  %v520_v46 = vld [vmem:[%s741_s6] ss:$0 sm:$0xff] }
  0x1e   :  { %341 = vmatpush.bf16.msra.mxu2 %v504_v18 }
  0x20   :  { %169 = vmatpush.bf16.msra.mxu0 %v486_v6 }
  0x21   :  { %256 = vmatpush.bf16.msra.mxu1 %v494_v7 }
  0x22   :  { %342 = vmatpush.bf16.msra.mxu2 %v503_v19 }
  0x24   :  { %170 = vmatpush.bf16.msra.mxu0 %v485_v8 }
  0x25   :  { %257 = vmatpush.bf16.msra.mxu1 %v493_v13 }
  0x26   :  { %343 = vmatpush.bf16.msra.mxu2 %v502_v20 }
  0x28   :  { %171 = vmatpush.bf16.msra.mxu0 %v484_v9 }
  0x29   :  { %258 = vmatpush.bf16.msra.mxu1 %v492_v14 }
  0x2a   :  { %344 = vmatpush.bf16.msra.mxu2 %v501_v31 }
  0x2c   :  { %172 = vmatpush.bf16.msra.mxu0 %v483_v10 }
  0x2d   :  { %259 = vmatpush.bf16.msra.mxu1 %v491_v15 }
  0x2e   :  { %345 = vmatpush.bf16.msra.mxu2 %v500_v32 }
  0x30   :  { %173 = vmatpush.bf16.msra.mxu0 %v482_v11 }
  0x31   :  { %260 = vmatpush.bf16.msra.mxu1 %v490_v16 }
  0x32   :  { %346 = vmatpush.bf16.msra.mxu2 %v499_v33 }
  0x33   :  { %174 = vmatmul.bf16.vlgmr.msra.gmra.mxu0 %v481_v12 }
  0x36   :  { %347 = vmatpush.bf16.msra.mxu2 %v498_v34 }
  0xb0   :  { %v175_v21 = vpop.f32.mrf.mxu0 }
  0xb1   :  { %v176_v23 = vadd.f32 %v518_v22, %v175_v21 }
  0xb3   :  { %v180_v25 = vmul.f32 0.2, %v176_v23 }
  0xb5   :  { %v182_v28 = vmax.f32 %v176_v23, %v180_v25 }
  0xb8   :  { %v177_v24 = vpop.f32.mrf.mxu0 }
  0xb9   :  { %v178_v26 = vadd.f32 %v518_v22, %v177_v24 }
  0xbb   :  { %v181_v27 = vmul.f32 0.2, %v178_v26 }
  0xbd   :  { %v183_v29 = vmax.f32 %v178_v26, %v181_v27 }
  0xbf   :  { %v184_v30 = vpack.c.bf16 %v183_v29, %v182_v28 }
  0xc1   :  { %261 = vmatmul.bf16.vlgmr.msra.gmra.mxu1 %v184_v30 }
 0x13e   :  { %v262_v35 = vpop.f32.mrf.mxu1 }
 0x13f   :  { %v263_v37 = vadd.f32 %v519_v36, %v262_v35 }
 0x141   :  { %v267_v39 = vmul.f32 0.2, %v263_v37 }
 0x143   :  { %v269_v42 = vmax.f32 %v263_v37, %v267_v39 }
 0x146   :  { %v264_v38 = vpop.f32.mrf.mxu1 }
 0x147   :  { %v265_v40 = vadd.f32 %v519_v36, %v264_v38 }
 0x149   :  { %v268_v41 = vmul.f32 0.2, %v265_v40 }
 0x14b   :  { %v270_v43 = vmax.f32 %v265_v40, %v268_v41 }
 0x14d   :  { %v271_v44 = vpack.c.bf16 %v270_v43, %v269_v42 }
 0x14f   :  { %348 = vmatmul.bf16.vlgmr.msra.gmra.mxu2 %v271_v44 }
 0x1d2   :  { %v349_v45 = vpop.f32.mrf.mxu2 }
 0x1d3   :  { %v350_v47 = vadd.f32 %v520_v46, %v349_v45 }
 0x1d5   :  { %v354_v50 = vmax.f32 %v350_v47, 0.0 }
 0x1da   :  { %v351_v48 = vpop.f32.mrf.mxu2 }
 0x1db   :  { %v352_v49 = vadd.f32 %v520_v46, %v351_v48 }
 0x1dd   :  { %v355_v51 = vmax.f32 %v352_v49, 0.0 }
 0x1df   :  { %v509_v52 = vpack.c.bf16 %v355_v51, %v354_v50 }
 0x1e1   :  { %510 = vst [vmem:[#allocation10] sm:$0xff] %v509_v52  }
 0x1e2   :  { %372 = dma.vmem_to_hbm [thread:$0]  %s365_s25, 128, %s367_s27, [#allocation4], %s650_s9, %s650_s9, %s651_s10  }
 0x1e3   :  { %647 = dma.done.wait [#allocation4], 128  }
 0x1e4   :  { %648 = vsyncadd [#allocation4], 4294967168 }
 0x1e5   :  { %377 = vsyncpa [#allocation3], 1 }
 0x1e6   :  { %378 = vsyncpa [#allocation6], 1 }
 0x1e7   :  { %379 = vsyncpa [#allocation9], 1 }
 0x1e8   :  { %380 = vsyncpa [#allocation4], 1 }

</bundles_post_ra>
